<compile_context>
chip_gen: v6e
topology: v6e:2x2x1
jax: 0.10.0
libtpu: 0.0.40
codegen_flags: <defaults>
</compile_context>

<pallas_src>
import functools

import numpy as np
import jax
import jax.numpy as jnp
from jax import lax
from jax.experimental import pallas as pl
from jax.experimental.pallas import tpu as pltpu


_TILE_BASE = 256  # N is padded up to a multiple of this; also the minimum tile.


def _pick_tile(n, cap):
    """Largest MXU/lane-friendly tile <= cap that divides n."""
    for t in (1024, 512, 256, 128, 64, 32, 16, 8):
        if t <= cap and n % t == 0:
            return t
    return n


# -----------------------------------------------------------------------------
# Kernel 1: dc = rsqrt(colsum(W)).
# Grid = (column tiles [parallel], row tiles [arbitrary]); the dc block index
# is constant along the row axis -> resident f32 accumulator.
# -----------------------------------------------------------------------------
def _colsum_kernel(w_ref, dc_ref):
    i = pl.program_id(1)

    @pl.when(i == 0)
    def _():
        dc_ref[...] = jnp.zeros_like(dc_ref)

    dc_ref[...] += jnp.sum(w_ref[...], axis=0, keepdims=True, dtype=jnp.float32)

    @pl.when(i == pl.num_programs(1) - 1)
    def _():
        dc_ref[...] = lax.rsqrt(dc_ref[...])


# -----------------------------------------------------------------------------
# Kernel 2: support_scaled = (feature_u @ P) * dc,  P = projection_u @ weight.
# Emitted in W's dtype so the big matmul sees matched MXU operands.
# -----------------------------------------------------------------------------
def _support_kernel(fu_ref, p_ref, dc_ref, sup_ref, *, precision):
    s = jnp.dot(fu_ref[...].astype(jnp.float32), p_ref[...],
                precision=precision, preferred_element_type=jnp.float32)
    sup_ref[...] = (dc_ref[...] * s).astype(sup_ref.dtype)


# -----------------------------------------------------------------------------
# Kernel 3: out = rsqrt(rowsum(W)) * (W @ support_scaled).
# out_ref block index is constant along k -> it is the resident f32 accumulator.
# -----------------------------------------------------------------------------
def _propagate_kernel(w_ref, sup_ref, out_ref, rowsum_ref, *, precision):
    k = pl.program_id(1)

    @pl.when(k == 0)
    def _():
        out_ref[...] = jnp.zeros_like(out_ref)
        rowsum_ref[...] = jnp.zeros_like(rowsum_ref)

    w = w_ref[...]
    # dtype-accumulated reduce (no explicit f32 materialization of the W tile).
    rowsum_ref[...] += jnp.sum(w, axis=1, keepdims=True, dtype=jnp.float32)
    out_ref[...] += jnp.dot(w, sup_ref[...],
                            precision=precision,
                            preferred_element_type=jnp.float32)

    @pl.when(k == pl.num_programs(1) - 1)
    def _():
        out_ref[...] = lax.rsqrt(rowsum_ref[...]) * out_ref[...]


def gcn_c_forward(weight_matrix, feature_u, feature_c,
                  projection_u, projection_c, weight,
                  *, precision=lax.Precision.HIGHEST):
    """Pallas TPU forward of GCN_C.

    feature_c / projection_c mirror the module signature but are dead in the
    returned output (projected_c is never used) -> never shipped to the TPU.
    Pass `weight_matrix` as bf16 to halve the dominant N^2 HBM stream
    (accumulation stays f32); the f32 demo uses precision=HIGHEST.
    """
    del feature_c, projection_c

    n_u, n_c = weight_matrix.shape
    if n_u != n_c:
        raise ValueError("GCN_C forward requires N_u == N_c (as in the reference).")
    n = n_u
    f_u = feature_u.shape[1]
    d = weight.shape[1]

    # --- pad N up to a multiple of _TILE_BASE (never fall back to a full-
    # extent tile).  Padded diagonal is set to 1 so padded degree sums are
    # finite; padded support rows are exactly 0 so they contribute nothing.
    n_pad = ((n + _TILE_BASE - 1) // _TILE_BASE) * _TILE_BASE
    if n_pad != n:
        pad = n_pad - n
        w_mat = jnp.pad(weight_matrix, ((0, pad), (0, pad)))
        idx = jnp.arange(n, n_pad)
        w_mat = w_mat.at[idx, idx].set(1.0)
        fu = jnp.pad(feature_u, ((0, pad), (0, 0)))
    else:
        w_mat, fu = weight_matrix, feature_u

    w_dtype = w_mat.dtype

    # Tiny [F_u, D] @ [D, D] -> reassociated so the N-sized matmul contracts F_u.
    p_mat = jnp.dot(projection_u, weight,
                    precision=precision, preferred_element_type=jnp.float32)

    # Tile sizes (multiples of 256, also multiples of 128 for v5e).
    tc = _pick_tile(n_pad, 1024)   # colsum column tile (lane axis)
    tr = _pick_tile(n_pad, 512)    # colsum row tile (reduction axis)
    tp = _pick_tile(n_pad, 512)    # support row tile
    tm = _pick_tile(n_pad, 512)    # propagate output-row tile
    tk = _pick_tile(n_pad, 1024)   # propagate contraction tile

    vmem_cap = 32 * 1024 * 1024    # explicit scoped-VMEM limit for the big tiles

    # ---- Kernel 1: dc = rsqrt(colsum(W)) -------------------------------------
    dc = pl.pallas_call(
        _colsum_kernel,
        out_shape=jax.ShapeDtypeStruct((1, n_pad), jnp.float32),
        grid_spec=pltpu.PrefetchScalarGridSpec(
            num_scalar_prefetch=0,
            grid=(n_pad // tc, n_pad // tr),
            in_specs=[pl.BlockSpec((tr, tc), lambda j, i: (i, j))],
            out_specs=pl.BlockSpec((1, tc), lambda j, i: (0, j))),
        compiler_params=pltpu.CompilerParams(
            dimension_semantics=("parallel", "arbitrary"),
            vmem_limit_bytes=vmem_cap),
    )(w_mat)

    dc_col = dc.reshape(n_pad, 1)   # per-row scale for support

    # ---- Kernel 2: support_scaled = (fu @ P) * dc (hoisted out of pass 3) ----
    support_scaled = pl.pallas_call(
        functools.partial(_support_kernel, precision=precision),
        out_shape=jax.ShapeDtypeStruct((n_pad, d), w_dtype),
        grid_spec=pltpu.PrefetchScalarGridSpec(
            num_scalar_prefetch=0,
            grid=(n_pad // tp,),
            in_specs=[
                pl.BlockSpec((tp, f_u), lambda i: (i, 0)),
                pl.BlockSpec((f_u, d), lambda i: (0, 0)),
                pl.BlockSpec((tp, 1), lambda i: (i, 0)),
            ],
            out_specs=pl.BlockSpec((tp, d), lambda i: (i, 0))),
        compiler_params=pltpu.CompilerParams(
            dimension_semantics=("parallel",)),
    )(fu, p_mat, dc_col)

    # ---- Kernel 3: out = du * (W @ support_scaled) ----------------------------
    out = pl.pallas_call(
        functools.partial(_propagate_kernel, precision=precision),
        out_shape=jax.ShapeDtypeStruct((n_pad, d), jnp.float32),
        grid_spec=pltpu.PrefetchScalarGridSpec(
            num_scalar_prefetch=0,
            grid=(n_pad // tm, n_pad // tk),
            in_specs=[
                pl.BlockSpec((tm, tk), lambda i, k: (i, k)),   # W tile
                pl.BlockSpec((tk, d), lambda i, k: (k, 0)),    # support k-tile
            ],
            out_specs=pl.BlockSpec((tm, d), lambda i, k: (i, 0)),
            scratch_shapes=[pltpu.VMEM((tm, 1), jnp.float32)]),  # rowsum acc
        compiler_params=pltpu.CompilerParams(
            dimension_semantics=("parallel", "arbitrary"),
            vmem_limit_bytes=vmem_cap),
    )(w_mat, support_scaled)

    return out[:n]


def glorot_init(key, input_dim, output_dim):
    init_range = np.sqrt(6.0 / (input_dim + output_dim))
    return jax.random.uniform(key, (input_dim, output_dim), jnp.float32,
                              minval=-init_range, maxval=init_range)


if __name__ == "__main__":
    # Small but multi-tile shapes: every grid axis (including the k-accumulation
    # in the propagation kernel) runs more than one step.  Lane-dense D = 128.
    N = 1536         # N_u == N_c (required by the reference forward)
    F_U = 16         # in_features_u
    F_C = 12         # in_features_c (dead path)
    D = 128          # out_features

    key = jax.random.PRNGKey(0)
    k_w, k_fu, k_fc, k_pu, k_pc, k_ww = jax.random.split(key, 6)

    projection_u = glorot_init(k_pu, F_U, D)
    projection_c = glorot_init(k_pc, F_C, D)
    weight = glorot_init(k_ww, D, D)

    # Positive adjacency weights so degree^-0.5 is well-defined.
    weight_matrix = jax.random.uniform(k_w, (N, N), jnp.float32,
                                       minval=0.1, maxval=1.0)
    feature_u = jax.random.normal(k_fu, (N, F_U), jnp.float32)
    feature_c = jax.random.normal(k_fc, (N, F_C), jnp.float32)

    out = gcn_c_forward(weight_matrix, feature_u, feature_c,
                        projection_u, projection_c, weight)
    out = jax.block_until_ready(out)

    # Pure-JAX reference (same math as the PyTorch forward); precision=HIGHEST
    # so the f32 comparison against the MXU is meaningful.
    prec = lax.Precision.HIGHEST
    proj_u_ref = jnp.matmul(feature_u, projection_u, precision=prec)
    support_ref = jnp.matmul(proj_u_ref, weight, precision=prec)
    du = jnp.power(jnp.sum(weight_matrix, axis=1), -0.5)
    dc = jnp.power(jnp.sum(weight_matrix, axis=0), -0.5)
    norm_w = du[:, None] * weight_matrix * dc[None, :]
    ref = jnp.matmul(norm_w, support_ref, precision=prec)

    assert out.shape == (N, D)
    np.testing.assert_allclose(np.asarray(out), np.asarray(ref),
                               rtol=1e-3, atol=1e-5)
    print("KERNEL_OK")
</pallas_src>

<mosaic_0001>
module attributes {stable_mosaic.version = 11 : i64} {
  func.func @_colsum_kernel(%arg0: i32, %arg1: i32, %arg2: memref<512x512xf32, #tpu.memory_space<vmem>>, %arg3: memref<1x512xf32, #tpu.memory_space<vmem>>) attributes {dimension_semantics = [#tpu.dimension_semantics<parallel>, #tpu.dimension_semantics<arbitrary>], iteration_bounds = array<i64: 3, 3>, scalar_prefetch = 0 : i64, scratch_operands = 0 : i64, tpu.core_type = #tpu.core_type<tc>, window_params = [{transform_indices = @transform_0, window_bounds = array<i64: 512, 512>}, {transform_indices = @transform_1, window_bounds = array<i64: 1, 512>}]} {
    %c0_i32 = arith.constant 0 : i32
    %0 = arith.cmpi eq, %arg1, %c0_i32 : i32
    %1 = arith.extui %0 : i1 to i32
    %c0_i32_0 = arith.constant 0 : i32
    %2 = arith.cmpi ne, %1, %c0_i32_0 : i32
    scf.if %2 {
      %cst_7 = arith.constant 0.000000e+00 : f32
      %12 = vector.broadcast %cst_7 : f32 to vector<1x512xf32>
      %c0_8 = arith.constant 0 : index
      %c0_9 = arith.constant 0 : index
      %13 = vector.load %arg3[%c0_8, %c0_9] : memref<1x512xf32, #tpu.memory_space<vmem>>, vector<1x512xf32>
      tpu.vector_store %arg3[%c0_8, %c0_9], %12 {strides = array<i32>} : memref<1x512xf32, #tpu.memory_space<vmem>>, vector<1x512xf32>,
    } else {
    }
    %c0 = arith.constant 0 : index
    %c0_1 = arith.constant 0 : index
    %3 = vector.load %arg3[%c0, %c0_1] : memref<1x512xf32, #tpu.memory_space<vmem>>, vector<1x512xf32>
    %c0_2 = arith.constant 0 : index
    %c0_3 = arith.constant 0 : index
    %4 = vector.load %arg2[%c0_2, %c0_3] : memref<512x512xf32, #tpu.memory_space<vmem>>, vector<512x512xf32>
    %cst = arith.constant dense<0.000000e+00> : vector<512xf32>
    %5 = vector.multi_reduction <add>, %4, %cst [0] : vector<512x512xf32> to vector<512xf32>
    %6 = vector.shape_cast %5 : vector<512xf32> to vector<1x512xf32>
    %7 = arith.addf %3, %6 : vector<1x512xf32>
    %c0_4 = arith.constant 0 : index
    %c0_5 = arith.constant 0 : index
    %8 = vector.load %arg3[%c0_4, %c0_5] : memref<1x512xf32, #tpu.memory_space<vmem>>, vector<1x512xf32>
    tpu.vector_store %arg3[%c0_4, %c0_5], %7 {strides = array<i32>} : memref<1x512xf32, #tpu.memory_space<vmem>>, vector<1x512xf32>,
    %c2_i32 = arith.constant 2 : i32
    %9 = arith.cmpi eq, %arg1, %c2_i32 : i32
    %10 = arith.extui %9 : i1 to i32
    %c0_i32_6 = arith.constant 0 : i32
    %11 = arith.cmpi ne, %10, %c0_i32_6 : i32
    scf.if %11 {
      %c0_7 = arith.constant 0 : index
      %c0_8 = arith.constant 0 : index
      %12 = vector.load %arg3[%c0_7, %c0_8] : memref<1x512xf32, #tpu.memory_space<vmem>>, vector<1x512xf32>
      %13 = math.rsqrt %12 : vector<1x512xf32>
      %c0_9 = arith.constant 0 : index
      %c0_10 = arith.constant 0 : index
      %14 = vector.load %arg3[%c0_9, %c0_10] : memref<1x512xf32, #tpu.memory_space<vmem>>, vector<1x512xf32>
      tpu.vector_store %arg3[%c0_9, %c0_10], %13 {strides = array<i32>} : memref<1x512xf32, #tpu.memory_space<vmem>>, vector<1x512xf32>,
    } else {
    }
    return
  }
  func.func @transform_0(%arg0: i32, %arg1: i32) -> (i32, i32) {
    %c0_i32 = arith.constant 0 : i32
    return %arg1, %arg0 : i32, i32
  }
  func.func @transform_1(%arg0: i32, %arg1: i32) -> (i32, i32) {
    %c0_i32 = arith.constant 0 : i32
    %c0_i32_0 = arith.constant 0 : i32
    return %c0_i32, %arg0 : i32, i32
  }
}

</mosaic_0001>

<bundles_post_ra>
// kernel: tpu_custom_call.1
= control target key start
LH: loop header
LB: loop body
LE: loop exit
PB: predicated region body
PF: predicated region fallthrough
CT: control target
= control target key end

     0   :  { %6 = vsyncpa [#allocation3], 0  ;;  %s1585_s0 = inlined_call_operand.hbm [shape: f32[1536,1536], index: 0, kind: input, shape index: {}]   ;;  %s1586_s1 = inlined_call_operand.hbm [shape: f32[1,1536], index: 1, kind: output, shape index: {}]  }
   0x1   :  { %8 = vsyncpa [#allocation3 + $0x1], 0 }
   0x2   :  { %9 = vsyncpa [#allocation4], 0 }
   0x3   :  { %11 = vsyncpa [#allocation4 + $0x1], 0  ;;  %s1135_s6 = smov 0   ;;  %s1137_s7 = smov 0  }
   0x4   :  { %s1139_s8 = smov 0   ;;  %s1141_s9 = smov 0  }
   0x5   :  { %s1143_s10 = smov 0   ;;  %s1145_s11 = smov 0  }
   0x6   :  { %s1147_s12 = smov 0   ;;  %s1149_s13 = smov 0  }
   0x7   :  { %s1151_s14 = smov 0   ;;  %s1153_s15 = smov 0  }
   0x8   :  { %s1155_s16 = smov 0  }
   0x9 LB: > { %1590 = sst [smem:[#allocation8_spill]] %s1112_s15  ;;  %s838_s17 = sadd.s32 4294967295, %s1116_s16   ;;  %s1116_s16 = sphi %s1155_s16, %s17_s16   ;;  %s1112_s15 = sphi %s1153_s15, %s1600_s15   ;;  %s1108_s14 = sphi %s1151_s14, %s1608_s14   ;;  %s1104_s13 = sphi %s1149_s13, %s1598_s13   ;;  %s1100_s12 = sphi %s1147_s12, %s1607_s12   ;;  %s1096_s11 = sphi %s1145_s11, %s1606_s11   ;;  %s1092_s10 = sphi %s1143_s10, %s1605_s10   ;;  %s1088_s9 = sphi %s1141_s9, %s1604_s9   ;;  %s1084_s8 = sphi %s1139_s8, %s1603_s8   ;;  %s1080_s7 = sphi %s1137_s7, %s1602_s7   ;;  %s1076_s6 = sphi %s1135_s6, %s1601_s6  }
   0xa   : > { %s839_s18 = sadd.s32 4294967294, %s1116_s16   ;;  %s26_s19 = sadd.s32 1, %s1108_s14 }
   0xb   : > { %s29_s20 = sadd.s32 1, %s1112_s15  ;;  %p27_p0 = scmp.ge.s32.totalorder %s26_s19, 3 }
   0xc   : > { %s38_s21 = sadd.s32 1, %s1096_s11  ;;  %p45_p1 = scmp.ne.s32.totalorder %s1096_s11, %s1092_s10 }
   0xd   : > { %p46_p2 = scmp.eq.s32.totalorder %s1116_s16, 0  ;;  %s1610_s19 = smov (%p27_p0, %s26_s19), 0 }
   0xe   : > { %1591 = sst [smem:[#allocation9_spill]] %s1610_s19  ;;  %s1612_s20 = smov (!%p27_p0, %s29_s20), %s1112_s15 }
   0xf   : > { %s33_s22 = ssub.s32 %s1108_s14, %s1610_s19  ;;  %p1201_p3 = por %p46_p2, %p45_p1 }
  0x10   : > { %p31_p4 = scmp.ge.s32.totalorder %s1612_s20, 3  ;;  %p51_p5 = scmp.ne.s32.totalorder %s1092_s10, %s1088_s9 }
  0x11   : > { %p52_p6 = scmp.eq.s32.totalorder %s838_s17, 0  ;;  %s64_s24 = sadd.s32 1, %s1084_s8 }
  0x12   : > { %s1614_s20 = smov (%p31_p4, %s1612_s20), 0  ;;  %p74_p8 = scmp.ne.s32.totalorder %s1084_s8, %s1080_s7 }
  0x13   : > { %1593 = sst [smem:[#allocation10_spill]] %s1614_s20  ;;  %p1209_p7 = por %p52_p6, %p51_p5 }
  0x14   : > { %s34_s26 = ssub.s32 %s1112_s15, %s1614_s20  ;;  %p75_p9 = scmp.eq.s32.totalorder %s838_s17, 8 }
  0x15   : > { %s35_s27 = sor.u32 %s34_s26, %s33_s22  ;;  %p62_p10 = scmp.eq.s32.totalorder %s34_s26, 0 }
  0x16   : > { %p36_p11 = scmp.eq.s32.totalorder %s35_s27, 0  ;;  %p1217_p12 = por %p75_p9, %p74_p8 }
  0x17   : > { %s1222_s29 = scalar_select %p62_p10, %s1084_s8, %s64_s24  }
  0x18   : > { %s1225_s30 = scalar_select %p36_p11, %s1096_s11, %s38_s21  }
  0x19   : > { %p80_p13 = scmp.ne.s32.totalorder %s1080_s7, %s1076_s6  ;;  %p81_p0 = scmp.eq.s32.totalorder %s839_s18, 8 }
  0x1a   : > { %p871_p1 = scmp.lt.s32.totalorder %s1116_s16, 9  ;;  %s101_s3 = sand.u32 1, %s1096_s11  }
  0x1b   : > { %p1230_p2 = por %p81_p0, %p80_p13  ;;  %s842_s4 = sshll.u32 %s101_s3, 11 }
  0x1c   : > { %s844_s5 = sshll.u32 %s1112_s15, 2  ;;  %s858_s9 = smul.u32 768, %s1108_s14 }
  0x1d   : > { %s105_s17 = scalar_lea.vmem [#allocation2], %s842_s4  ;;  %p1239_p4 = pnand %p871_p1, %p1201_p3 }
  0x1e   : > { %s115_s22 = sshll.u32 %s105_s17, 4  ;;  %s112_s21 = sadd.s32 %s858_s9, %s844_s5  ;;  %s116_s22 = int_to_ptr.vmem [resolvable:$true] %s115_s22 }
  0x1f   : > { %s846_s18 = sshll.u32 %s112_s21, 7  ;;  %p847_p5 = scmp.ge.s32.totalorder %s1116_s16, 1 }
  0x20   : > { %s114_s20 = scalar_lea.hbm %s1585_s0, %s846_s18  ;;  %s102_s19 = scalar_lea.sflag [#allocation3], %s101_s3 }
  0x21   : > { %p970_p6 = pneg %p1239_p4  ;;  %s981_s15 = scalar_lea.vmem %s116_s22, 32768 }
  0x22   : > { %p982_p8 = scmp.ne.s32.totalorder %s116_s22, %s981_s15  ;;  %s1118_s23 = smov [#allocation2]  }
  0x23   : > { %s986_s4 = sshll.u32 %s1118_s23, 4  ;;  %s987_s4 = int_to_ptr.vmem [resolvable:$false] %s986_s4 }
  0x24   : > { %p984_p9 = pnand %p982_p8, %p970_p6  ;;  %s988_s17 = scalar_lea.vmem %s987_s4, 65536 }
  0x25   : > { %p989_p3 = scmp.lt.s32.totalorder %s116_s22, %s987_s4  ;;  %p990_p11 = scmp.lt.s32.totalorder %s988_s17, %s981_s15 }
  0x26   : > { %p985_p10 = pneg %p984_p9 }
  0x27   : > { %p991_p13 = por %p990_p11, %p989_p3 }
  0x29   : > { %p992_p0 = pnand %p991_p13, %p985_p10 }
  0x2b   : > { %995 = shalt.err (!%p992_p0)
}
  0x2c   : > { %s1119_s5 = smov 1536   ;;  %s1120_s3 = smov 512  }
  0x2d   : > { %s1121_s9 = smov 32   ;;  %p123_p1 = scmp.lt.s32.totalorder %s1116_s16, 10 }
  0x2e   : > { %866 = dma.hbm_to_vmem [thread:$0]  (!%p1239_p4), %s114_s20, 32768, %s116_s22, %s102_s19, %s1119_s5, %s1120_s3, %s1121_s9  }
  0x2f   : > { %p124_p6 = pnand %p847_p5, %p123_p1 }
  0x30   : > { %s129_s21 = sand.u32 (!%p124_p6), 1, %s1092_s10  }
  0x31   : > { %127 = sbr.rel (%p124_p6) target bundleno = 263 (0x107), region = 24  ;;  %s848_s18 = sshll.u32 (!%p124_p6), %s129_s21, 11 }
  0x32   : > { %s130_s15 = scalar_lea.sflag (!%p124_p6), [#allocation3], %s129_s21  ;;  %s1255_s26 = scalar_lea.vmem (!%p124_p6), [#allocation2], %s848_s18 }
  0x36   : > { %1067 = dma.done.wait (%p1209_p7), %s130_s15, 32768  }
  0x37   : > { %1069 = vsyncadd (%p1209_p7), %s130_s15, 4294934528  ;;  %s149_s24 = sand.u32 1, %s1080_s7   ;;  %p850_p4 = scmp.ne.s32.totalorder %s1100_s12, 0 }
  0x38   : > { %s849_s19 = sshll.u32 %s149_s24, 2 }
  0x39   : > { %s1264_s20 = scalar_lea.vmem [#allocation5], %s849_s19  ;;  %158 = sbr.rel (%p850_p4) target bundleno = 66 (0x42), region = 32 }
  0x3e   : > { %v159_v0 = vlaneseq  ;;  %v1122_v1 = vmov 0.0  }
  0x40   : > { %vm161_vm0 = vcmp.lt.s32.totalorder %v159_v0, 512 }
  0x41   : > { %163 = vst.msk [vmem:[%s1264_s20] sm:$0xf] %vm161_vm0, %v1122_v1 }
  0x42 PF: > { %v165_v2 = vld [vmem:[%s1255_s26] sm:$0xff]  ;;  %v166_v3 = vld [vmem:[%s1255_s26 + $0x8] sm:$0xff]  ;;  %v167_v4 = vld [vmem:[%s1255_s26 + $0x10] sm:$0xff]  ;;  %p851_p7 = scmp.ne.s32.totalorder %s1100_s12, 2 }
  0x43   : > { %v168_v5 = vld [vmem:[%s1255_s26 + $0x18] sm:$0xff]  ;;  %v169_v6 = vld [vmem:[%s1255_s26 + $0x20] sm:$0xff]  ;;  %v170_v7 = vld [vmem:[%s1255_s26 + $0x28] sm:$0xff] }
  0x44   : > { %v171_v8 = vld [vmem:[%s1255_s26 + $0x30] sm:$0xff]  ;;  %v172_v9 = vld [vmem:[%s1255_s26 + $0x38] sm:$0xff]  ;;  %v421_v10 = vadd.f32 %v169_v6, %v165_v2  ;;  %v173_v11 = vld [vmem:[%s1255_s26 + $0x40] sm:$0xff]  ;;  %v490_v14 = vadd.f32 %v170_v7, %v166_v3 }
  0x45   : > { %v174_v12 = vld [vmem:[%s1255_s26 + $0x48] sm:$0xff]  ;;  %v175_v13 = vld [vmem:[%s1255_s26 + $0x50] sm:$0xff]  ;;  %v559_v15 = vadd.f32 %v171_v8, %v167_v4  ;;  %v628_v16 = vadd.f32 %v172_v9, %v168_v5  ;;  %v176_v17 = vld [vmem:[%s1255_s26 + $0x58] sm:$0xff] }
  0x46   : > { %v177_v18 = vld [vmem:[%s1255_s26 + $0x60] sm:$0xff]  ;;  %v178_v19 = vld [vmem:[%s1255_s26 + $0x68] sm:$0xff]  ;;  %v422_v20 = vadd.f32 %v421_v10, %v173_v11  ;;  %v179_v21 = vld [vmem:[%s1255_s26 + $0x70] sm:$0xff]  ;;  %v491_v24 = vadd.f32 %v490_v14, %v174_v12 }
  0x47   : > { %v180_v22 = vld [vmem:[%s1255_s26 + $0x78] sm:$0xff]  ;;  %v181_v23 = vld [vmem:[%s1255_s26 + $0x80] sm:$0xff]  ;;  %v560_v25 = vadd.f32 %v559_v15, %v175_v13  ;;  %v629_v26 = vadd.f32 %v628_v16, %v176_v17  ;;  %v182_v27 = vld [vmem:[%s1255_s26 + $0x88] sm:$0xff] }
  0x48   : > { %v183_v28 = vld [vmem:[%s1255_s26 + $0x90] sm:$0xff]  ;;  %v184_v29 = vld [vmem:[%s1255_s26 + $0x98] sm:$0xff]  ;;  %v423_v30 = vadd.f32 %v422_v20, %v177_v18  ;;  %v185_v31 = vld [vmem:[%s1255_s26 + $0xa0] sm:$0xff]  ;;  %v492_v32 = vadd.f32 %v491_v24, %v178_v19 }
  0x49   : > { %v561_v33 = vadd.f32 %v560_v25, %v179_v21  ;;  %v630_v34 = vadd.f32 %v629_v26, %v180_v22  ;;  %v186_v35 = vld [vmem:[%s1255_s26 + $0xa8] sm:$0xff]  ;;  %v187_v36 = vld [vmem:[%s1255_s26 + $0xb0] sm:$0xff]  ;;  %v188_v37 = vld [vmem:[%s1255_s26 + $0xb8] sm:$0xff] }
  0x4a   : > { %v424_v38 = vadd.f32 %v423_v30, %v181_v23  ;;  %v189_v39 = vld [vmem:[%s1255_s26 + $0xc0] sm:$0xff]  ;;  %v493_v40 = vadd.f32 %v492_v32, %v182_v27  ;;  %v190_v43 = vld [vmem:[%s1255_s26 + $0xc8] sm:$0xff]  ;;  %v191_v44 = vld [vmem:[%s1255_s26 + $0xd0] sm:$0xff] }
  0x4b   : > { %v562_v41 = vadd.f32 %v561_v33, %v183_v28  ;;  %v631_v42 = vadd.f32 %v630_v34, %v184_v29  ;;  %v192_v45 = vld [vmem:[%s1255_s26 + $0xd8] sm:$0xff]  ;;  %v193_v47 = vld [vmem:[%s1255_s26 + $0xe0] sm:$0xff]  ;;  %v194_v51 = vld [vmem:[%s1255_s26 + $0xe8] sm:$0xff] }
  0x4c   : > { %v425_v46 = vadd.f32 %v424_v38, %v185_v31  ;;  %v494_v48 = vadd.f32 %v493_v40, %v186_v35  ;;  %v195_v52 = vld [vmem:[%s1255_s26 + $0xf0] sm:$0xff]  ;;  %v196_v53 = vld [vmem:[%s1255_s26 + $0xf8] sm:$0xff]  ;;  %v197_v55 = vld [vmem:[%s1255_s26 + $0x100] sm:$0xff] }
  0x4d   : > { %v563_v49 = vadd.f32 %v562_v41, %v187_v36  ;;  %v632_v50 = vadd.f32 %v631_v42, %v188_v37  ;;  %v198_v59 = vld [vmem:[%s1255_s26 + $0x108] sm:$0xff]  ;;  %v199_v60 = vld [vmem:[%s1255_s26 + $0x110] sm:$0xff]  ;;  %v200_v61 = vld [vmem:[%s1255_s26 + $0x118] sm:$0xff] }
  0x4e   : > { %v426_v54 = vadd.f32 %v425_v46, %v189_v39  ;;  %v495_v56 = vadd.f32 %v494_v48, %v190_v43  ;;  %v201_v63 = vld [vmem:[%s1255_s26 + $0x120] sm:$0xff]  ;;  %v202_v3 = vld [vmem:[%s1255_s26 + $0x128] sm:$0xff]  ;;  %v203_v4 = vld [vmem:[%s1255_s26 + $0x130] sm:$0xff] }
  0x4f   : > { %v564_v57 = vadd.f32 %v563_v49, %v191_v44  ;;  %v633_v58 = vadd.f32 %v632_v50, %v192_v45  ;;  %v204_v5 = vld [vmem:[%s1255_s26 + $0x138] sm:$0xff]  ;;  %v205_v7 = vld [vmem:[%s1255_s26 + $0x140] sm:$0xff]  ;;  %v206_v11 = vld [vmem:[%s1255_s26 + $0x148] sm:$0xff] }
  0x50   : > { %v427_v62 = vadd.f32 %v426_v54, %v193_v47  ;;  %v496_v0 = vadd.f32 %v495_v56, %v194_v51  ;;  %v207_v12 = vld [vmem:[%s1255_s26 + $0x150] sm:$0xff]  ;;  %v208_v13 = vld [vmem:[%s1255_s26 + $0x158] sm:$0xff]  ;;  %v209_v15 = vld [vmem:[%s1255_s26 + $0x160] sm:$0xff] }
  0x51   : > { %v565_v1 = vadd.f32 %v564_v57, %v195_v52  ;;  %v634_v2 = vadd.f32 %v633_v58, %v196_v53  ;;  %v210_v19 = vld [vmem:[%s1255_s26 + $0x168] sm:$0xff]  ;;  %v211_v20 = vld [vmem:[%s1255_s26 + $0x170] sm:$0xff]  ;;  %v212_v21 = vld [vmem:[%s1255_s26 + $0x178] sm:$0xff] }
  0x52   : > { %v428_v6 = vadd.f32 %v427_v62, %v197_v55  ;;  %v497_v8 = vadd.f32 %v496_v0, %v198_v59  ;;  %v213_v23 = vld [vmem:[%s1255_s26 + $0x180] sm:$0xff]  ;;  %v214_v27 = vld [vmem:[%s1255_s26 + $0x188] sm:$0xff]  ;;  %v215_v28 = vld [vmem:[%s1255_s26 + $0x190] sm:$0xff] }
  0x53   : > { %v566_v9 = vadd.f32 %v565_v1, %v199_v60  ;;  %v635_v10 = vadd.f32 %v634_v2, %v200_v61  ;;  %v216_v29 = vld [vmem:[%s1255_s26 + $0x198] sm:$0xff]  ;;  %v217_v31 = vld [vmem:[%s1255_s26 + $0x1a0] sm:$0xff]  ;;  %v218_v35 = vld [vmem:[%s1255_s26 + $0x1a8] sm:$0xff] }
  0x54   : > { %v429_v14 = vadd.f32 %v428_v6, %v201_v63  ;;  %v498_v16 = vadd.f32 %v497_v8, %v202_v3  ;;  %v219_v36 = vld [vmem:[%s1255_s26 + $0x1b0] sm:$0xff]  ;;  %v220_v37 = vld [vmem:[%s1255_s26 + $0x1b8] sm:$0xff]  ;;  %v221_v39 = vld [vmem:[%s1255_s26 + $0x1c0] sm:$0xff] }
  0x55   : > { %v567_v17 = vadd.f32 %v566_v9, %v203_v4  ;;  %v636_v18 = vadd.f32 %v635_v10, %v204_v5  ;;  %v222_v43 = vld [vmem:[%s1255_s26 + $0x1c8] sm:$0xff]  ;;  %v223_v44 = vld [vmem:[%s1255_s26 + $0x1d0] sm:$0xff]  ;;  %v224_v45 = vld [vmem:[%s1255_s26 + $0x1d8] sm:$0xff] }
  0x56   : > { %v430_v22 = vadd.f32 %v429_v14, %v205_v7  ;;  %v499_v24 = vadd.f32 %v498_v16, %v206_v11  ;;  %v225_v47 = vld [vmem:[%s1255_s26 + $0x1e0] sm:$0xff]  ;;  %v226_v51 = vld [vmem:[%s1255_s26 + $0x1e8] sm:$0xff]  ;;  %v227_v52 = vld [vmem:[%s1255_s26 + $0x1f0] sm:$0xff] }
  0x57   : > { %v568_v25 = vadd.f32 %v567_v17, %v207_v12  ;;  %v637_v26 = vadd.f32 %v636_v18, %v208_v13  ;;  %v228_v53 = vld [vmem:[%s1255_s26 + $0x1f8] sm:$0xff]  ;;  %v229_v55 = vld [vmem:[%s1255_s26 + $0x200] sm:$0xff]  ;;  %v230_v59 = vld [vmem:[%s1255_s26 + $0x208] sm:$0xff] }
  0x58   : > { %v431_v30 = vadd.f32 %v430_v22, %v209_v15  ;;  %v500_v32 = vadd.f32 %v499_v24, %v210_v19  ;;  %v231_v60 = vld [vmem:[%s1255_s26 + $0x210] sm:$0xff]  ;;  %v232_v61 = vld [vmem:[%s1255_s26 + $0x218] sm:$0xff]  ;;  %v233_v63 = vld [vmem:[%s1255_s26 + $0x220] sm:$0xff] }
  0x59   : > { %v569_v33 = vadd.f32 %v568_v25, %v211_v20  ;;  %v638_v34 = vadd.f32 %v637_v26, %v212_v21  ;;  %v234_v3 = vld [vmem:[%s1255_s26 + $0x228] sm:$0xff]  ;;  %v235_v4 = vld [vmem:[%s1255_s26 + $0x230] sm:$0xff]  ;;  %v236_v5 = vld [vmem:[%s1255_s26 + $0x238] sm:$0xff] }
  0x5a   : > { %v432_v38 = vadd.f32 %v431_v30, %v213_v23  ;;  %v501_v40 = vadd.f32 %v500_v32, %v214_v27  ;;  %v237_v7 = vld [vmem:[%s1255_s26 + $0x240] sm:$0xff]  ;;  %v238_v11 = vld [vmem:[%s1255_s26 + $0x248] sm:$0xff]  ;;  %v239_v12 = vld [vmem:[%s1255_s26 + $0x250] sm:$0xff] }
  0x5b   : > { %v570_v41 = vadd.f32 %v569_v33, %v215_v28  ;;  %v639_v42 = vadd.f32 %v638_v34, %v216_v29  ;;  %v240_v13 = vld [vmem:[%s1255_s26 + $0x258] sm:$0xff]  ;;  %v241_v15 = vld [vmem:[%s1255_s26 + $0x260] sm:$0xff]  ;;  %v242_v19 = vld [vmem:[%s1255_s26 + $0x268] sm:$0xff] }
  0x5c   : > { %v433_v46 = vadd.f32 %v432_v38, %v217_v31  ;;  %v502_v48 = vadd.f32 %v501_v40, %v218_v35  ;;  %v243_v20 = vld [vmem:[%s1255_s26 + $0x270] sm:$0xff]  ;;  %v244_v21 = vld [vmem:[%s1255_s26 + $0x278] sm:$0xff]  ;;  %v245_v23 = vld [vmem:[%s1255_s26 + $0x280] sm:$0xff] }
  0x5d   : > { %v571_v49 = vadd.f32 %v570_v41, %v219_v36  ;;  %v640_v50 = vadd.f32 %v639_v42, %v220_v37  ;;  %v246_v27 = vld [vmem:[%s1255_s26 + $0x288] sm:$0xff]  ;;  %v247_v28 = vld [vmem:[%s1255_s26 + $0x290] sm:$0xff]  ;;  %v248_v29 = vld [vmem:[%s1255_s26 + $0x298] sm:$0xff] }
  0x5e   : > { %v434_v54 = vadd.f32 %v433_v46, %v221_v39  ;;  %v503_v56 = vadd.f32 %v502_v48, %v222_v43  ;;  %v249_v31 = vld [vmem:[%s1255_s26 + $0x2a0] sm:$0xff]  ;;  %v250_v35 = vld [vmem:[%s1255_s26 + $0x2a8] sm:$0xff]  ;;  %v251_v36 = vld [vmem:[%s1255_s26 + $0x2b0] sm:$0xff] }
  0x5f   : > { %v572_v57 = vadd.f32 %v571_v49, %v223_v44  ;;  %v641_v58 = vadd.f32 %v640_v50, %v224_v45  ;;  %v252_v37 = vld [vmem:[%s1255_s26 + $0x2b8] sm:$0xff]  ;;  %v253_v39 = vld [vmem:[%s1255_s26 + $0x2c0] sm:$0xff]  ;;  %v254_v43 = vld [vmem:[%s1255_s26 + $0x2c8] sm:$0xff] }
  0x60   : > { %v435_v62 = vadd.f32 %v434_v54, %v225_v47  ;;  %v504_v0 = vadd.f32 %v503_v56, %v226_v51  ;;  %v255_v44 = vld [vmem:[%s1255_s26 + $0x2d0] sm:$0xff]  ;;  %v256_v45 = vld [vmem:[%s1255_s26 + $0x2d8] sm:$0xff]  ;;  %v257_v47 = vld [vmem:[%s1255_s26 + $0x2e0] sm:$0xff] }
  0x61   : > { %v573_v1 = vadd.f32 %v572_v57, %v227_v52  ;;  %v642_v2 = vadd.f32 %v641_v58, %v228_v53  ;;  %v258_v51 = vld [vmem:[%s1255_s26 + $0x2e8] sm:$0xff]  ;;  %v259_v52 = vld [vmem:[%s1255_s26 + $0x2f0] sm:$0xff]  ;;  %v260_v53 = vld [vmem:[%s1255_s26 + $0x2f8] sm:$0xff] }
  0x62   : > { %v436_v6 = vadd.f32 %v435_v62, %v229_v55  ;;  %v505_v8 = vadd.f32 %v504_v0, %v230_v59  ;;  %v261_v55 = vld [vmem:[%s1255_s26 + $0x300] sm:$0xff]  ;;  %v262_v59 = vld [vmem:[%s1255_s26 + $0x308] sm:$0xff] }
  0x63   : > { %v574_v9 = vadd.f32 %v573_v1, %v231_v60  ;;  %v643_v10 = vadd.f32 %v642_v2, %v232_v61  ;;  %v263_v60 = vld [vmem:[%s1255_s26 + $0x310] sm:$0xff]  ;;  %v264_v61 = vld [vmem:[%s1255_s26 + $0x318] sm:$0xff] }
  0x64   : > { %v437_v14 = vadd.f32 %v436_v6, %v233_v63  ;;  %v506_v16 = vadd.f32 %v505_v8, %v234_v3  ;;  %v265_v63 = vld [vmem:[%s1255_s26 + $0x320] sm:$0xff]  ;;  %v266_v3 = vld [vmem:[%s1255_s26 + $0x328] sm:$0xff] }
  0x65   : > { %v575_v17 = vadd.f32 %v574_v9, %v235_v4  ;;  %v644_v18 = vadd.f32 %v643_v10, %v236_v5  ;;  %v267_v4 = vld [vmem:[%s1255_s26 + $0x330] sm:$0xff]  ;;  %v268_v5 = vld [vmem:[%s1255_s26 + $0x338] sm:$0xff] }
  0x66   : > { %v438_v22 = vadd.f32 %v437_v14, %v237_v7  ;;  %v507_v24 = vadd.f32 %v506_v16, %v238_v11  ;;  %v269_v7 = vld [vmem:[%s1255_s26 + $0x340] sm:$0xff]  ;;  %v270_v11 = vld [vmem:[%s1255_s26 + $0x348] sm:$0xff] }
  0x67   : > { %v576_v25 = vadd.f32 %v575_v17, %v239_v12  ;;  %v645_v26 = vadd.f32 %v644_v18, %v240_v13  ;;  %v271_v12 = vld [vmem:[%s1255_s26 + $0x350] sm:$0xff]  ;;  %v272_v13 = vld [vmem:[%s1255_s26 + $0x358] sm:$0xff] }
  0x68   : > { %v439_v30 = vadd.f32 %v438_v22, %v241_v15  ;;  %v508_v32 = vadd.f32 %v507_v24, %v242_v19  ;;  %v273_v15 = vld [vmem:[%s1255_s26 + $0x360] sm:$0xff]  ;;  %v274_v19 = vld [vmem:[%s1255_s26 + $0x368] sm:$0xff] }
  0x69   : > { %v577_v33 = vadd.f32 %v576_v25, %v243_v20  ;;  %v646_v34 = vadd.f32 %v645_v26, %v244_v21  ;;  %v275_v20 = vld [vmem:[%s1255_s26 + $0x370] sm:$0xff]  ;;  %v276_v21 = vld [vmem:[%s1255_s26 + $0x378] sm:$0xff] }
  0x6a   : > { %v440_v38 = vadd.f32 %v439_v30, %v245_v23  ;;  %v509_v40 = vadd.f32 %v508_v32, %v246_v27  ;;  %v277_v23 = vld [vmem:[%s1255_s26 + $0x380] sm:$0xff]  ;;  %v278_v27 = vld [vmem:[%s1255_s26 + $0x388] sm:$0xff] }
  0x6b   : > { %v578_v41 = vadd.f32 %v577_v33, %v247_v28  ;;  %v647_v42 = vadd.f32 %v646_v34, %v248_v29  ;;  %v279_v28 = vld [vmem:[%s1255_s26 + $0x390] sm:$0xff]  ;;  %v280_v29 = vld [vmem:[%s1255_s26 + $0x398] sm:$0xff] }
  0x6c   : > { %v441_v46 = vadd.f32 %v440_v38, %v249_v31  ;;  %v510_v48 = vadd.f32 %v509_v40, %v250_v35  ;;  %v281_v31 = vld [vmem:[%s1255_s26 + $0x3a0] sm:$0xff]  ;;  %v282_v35 = vld [vmem:[%s1255_s26 + $0x3a8] sm:$0xff] }
  0x6d   : > { %v579_v49 = vadd.f32 %v578_v41, %v251_v36  ;;  %v648_v50 = vadd.f32 %v647_v42, %v252_v37  ;;  %v283_v36 = vld [vmem:[%s1255_s26 + $0x3b0] sm:$0xff]  ;;  %v284_v37 = vld [vmem:[%s1255_s26 + $0x3b8] sm:$0xff] }
  0x6e   : > { %v442_v54 = vadd.f32 %v441_v46, %v253_v39  ;;  %v511_v56 = vadd.f32 %v510_v48, %v254_v43  ;;  %v285_v39 = vld [vmem:[%s1255_s26 + $0x3c0] sm:$0xff]  ;;  %v286_v43 = vld [vmem:[%s1255_s26 + $0x3c8] sm:$0xff] }
  0x6f   : > { %v580_v57 = vadd.f32 %v579_v49, %v255_v44  ;;  %v649_v58 = vadd.f32 %v648_v50, %v256_v45  ;;  %v287_v44 = vld [vmem:[%s1255_s26 + $0x3d0] sm:$0xff]  ;;  %v288_v45 = vld [vmem:[%s1255_s26 + $0x3d8] sm:$0xff] }
  0x70   : > { %v443_v62 = vadd.f32 %v442_v54, %v257_v47  ;;  %v512_v0 = vadd.f32 %v511_v56, %v258_v51  ;;  %v289_v47 = vld [vmem:[%s1255_s26 + $0x3e0] sm:$0xff]  ;;  %v290_v51 = vld [vmem:[%s1255_s26 + $0x3e8] sm:$0xff] }
  0x71   : > { %v581_v1 = vadd.f32 %v580_v57, %v259_v52  ;;  %v650_v2 = vadd.f32 %v649_v58, %v260_v53  ;;  %v291_v52 = vld [vmem:[%s1255_s26 + $0x3f0] sm:$0xff]  ;;  %v292_v53 = vld [vmem:[%s1255_s26 + $0x3f8] sm:$0xff] }
  0x72   : > { %v444_v6 = vadd.f32 %v443_v62, %v261_v55  ;;  %v513_v8 = vadd.f32 %v512_v0, %v262_v59  ;;  %v293_v55 = vld [vmem:[%s1255_s26 + $0x400] sm:$0xff]  ;;  %v294_v59 = vld [vmem:[%s1255_s26 + $0x408] sm:$0xff] }
  0x73   : > { %v582_v9 = vadd.f32 %v581_v1, %v263_v60  ;;  %v651_v10 = vadd.f32 %v650_v2, %v264_v61  ;;  %v295_v60 = vld [vmem:[%s1255_s26 + $0x410] sm:$0xff]  ;;  %v296_v61 = vld [vmem:[%s1255_s26 + $0x418] sm:$0xff] }
  0x74   : > { %v445_v14 = vadd.f32 %v444_v6, %v265_v63  ;;  %v514_v16 = vadd.f32 %v513_v8, %v266_v3  ;;  %v297_v63 = vld [vmem:[%s1255_s26 + $0x420] sm:$0xff]  ;;  %v298_v3 = vld [vmem:[%s1255_s26 + $0x428] sm:$0xff] }
  0x75   : > { %v583_v17 = vadd.f32 %v582_v9, %v267_v4  ;;  %v652_v18 = vadd.f32 %v651_v10, %v268_v5  ;;  %v299_v4 = vld [vmem:[%s1255_s26 + $0x430] sm:$0xff]  ;;  %v300_v5 = vld [vmem:[%s1255_s26 + $0x438] sm:$0xff] }
  0x76   : > { %v446_v22 = vadd.f32 %v445_v14, %v269_v7  ;;  %v515_v24 = vadd.f32 %v514_v16, %v270_v11  ;;  %v301_v7 = vld [vmem:[%s1255_s26 + $0x440] sm:$0xff]  ;;  %v302_v11 = vld [vmem:[%s1255_s26 + $0x448] sm:$0xff] }
  0x77   : > { %v584_v25 = vadd.f32 %v583_v17, %v271_v12  ;;  %v653_v26 = vadd.f32 %v652_v18, %v272_v13  ;;  %v303_v12 = vld [vmem:[%s1255_s26 + $0x450] sm:$0xff]  ;;  %v304_v13 = vld [vmem:[%s1255_s26 + $0x458] sm:$0xff] }
  0x78   : > { %v447_v30 = vadd.f32 %v446_v22, %v273_v15  ;;  %v516_v32 = vadd.f32 %v515_v24, %v274_v19  ;;  %v305_v15 = vld [vmem:[%s1255_s26 + $0x460] sm:$0xff]  ;;  %v306_v19 = vld [vmem:[%s1255_s26 + $0x468] sm:$0xff] }
  0x79   : > { %v585_v33 = vadd.f32 %v584_v25, %v275_v20  ;;  %v654_v34 = vadd.f32 %v653_v26, %v276_v21  ;;  %v307_v20 = vld [vmem:[%s1255_s26 + $0x470] sm:$0xff]  ;;  %v308_v21 = vld [vmem:[%s1255_s26 + $0x478] sm:$0xff] }
  0x7a   : > { %v448_v38 = vadd.f32 %v447_v30, %v277_v23  ;;  %v517_v40 = vadd.f32 %v516_v32, %v278_v27  ;;  %v309_v23 = vld [vmem:[%s1255_s26 + $0x480] sm:$0xff]  ;;  %v310_v27 = vld [vmem:[%s1255_s26 + $0x488] sm:$0xff] }
  0x7b   : > { %v586_v41 = vadd.f32 %v585_v33, %v279_v28  ;;  %v655_v42 = vadd.f32 %v654_v34, %v280_v29  ;;  %v311_v28 = vld [vmem:[%s1255_s26 + $0x490] sm:$0xff]  ;;  %v312_v29 = vld [vmem:[%s1255_s26 + $0x498] sm:$0xff] }
  0x7c   : > { %v449_v46 = vadd.f32 %v448_v38, %v281_v31  ;;  %v518_v48 = vadd.f32 %v517_v40, %v282_v35  ;;  %v313_v31 = vld [vmem:[%s1255_s26 + $0x4a0] sm:$0xff]  ;;  %v314_v35 = vld [vmem:[%s1255_s26 + $0x4a8] sm:$0xff] }
  0x7d   : > { %v587_v49 = vadd.f32 %v586_v41, %v283_v36  ;;  %v656_v50 = vadd.f32 %v655_v42, %v284_v37  ;;  %v315_v36 = vld [vmem:[%s1255_s26 + $0x4b0] sm:$0xff]  ;;  %v316_v37 = vld [vmem:[%s1255_s26 + $0x4b8] sm:$0xff] }
  0x7e   : > { %v450_v54 = vadd.f32 %v449_v46, %v285_v39  ;;  %v519_v56 = vadd.f32 %v518_v48, %v286_v43  ;;  %v317_v39 = vld [vmem:[%s1255_s26 + $0x4c0] sm:$0xff]  ;;  %v318_v43 = vld [vmem:[%s1255_s26 + $0x4c8] sm:$0xff] }
  0x7f   : > { %v588_v57 = vadd.f32 %v587_v49, %v287_v44  ;;  %v657_v58 = vadd.f32 %v656_v50, %v288_v45  ;;  %v319_v44 = vld [vmem:[%s1255_s26 + $0x4d0] sm:$0xff]  ;;  %v320_v45 = vld [vmem:[%s1255_s26 + $0x4d8] sm:$0xff] }
  0x80   : > { %v451_v62 = vadd.f32 %v450_v54, %v289_v47  ;;  %v520_v0 = vadd.f32 %v519_v56, %v290_v51  ;;  %v321_v47 = vld [vmem:[%s1255_s26 + $0x4e0] sm:$0xff]  ;;  %v322_v51 = vld [vmem:[%s1255_s26 + $0x4e8] sm:$0xff] }
  0x81   : > { %v589_v1 = vadd.f32 %v588_v57, %v291_v52  ;;  %v658_v2 = vadd.f32 %v657_v58, %v292_v53  ;;  %v323_v52 = vld [vmem:[%s1255_s26 + $0x4f0] sm:$0xff]  ;;  %v324_v53 = vld [vmem:[%s1255_s26 + $0x4f8] sm:$0xff] }
  0x82   : > { %v452_v6 = vadd.f32 %v451_v62, %v293_v55  ;;  %v521_v8 = vadd.f32 %v520_v0, %v294_v59  ;;  %v325_v55 = vld [vmem:[%s1255_s26 + $0x500] sm:$0xff]  ;;  %v326_v59 = vld [vmem:[%s1255_s26 + $0x508] sm:$0xff] }
  0x83   : > { %v590_v9 = vadd.f32 %v589_v1, %v295_v60  ;;  %v659_v10 = vadd.f32 %v658_v2, %v296_v61  ;;  %v327_v60 = vld [vmem:[%s1255_s26 + $0x510] sm:$0xff]  ;;  %v328_v61 = vld [vmem:[%s1255_s26 + $0x518] sm:$0xff] }
  0x84   : > { %v453_v14 = vadd.f32 %v452_v6, %v297_v63  ;;  %v522_v16 = vadd.f32 %v521_v8, %v298_v3  ;;  %v329_v63 = vld [vmem:[%s1255_s26 + $0x520] sm:$0xff]  ;;  %v330_v3 = vld [vmem:[%s1255_s26 + $0x528] sm:$0xff] }
  0x85   : > { %v591_v17 = vadd.f32 %v590_v9, %v299_v4  ;;  %v660_v18 = vadd.f32 %v659_v10, %v300_v5  ;;  %v331_v4 = vld [vmem:[%s1255_s26 + $0x530] sm:$0xff]  ;;  %v332_v5 = vld [vmem:[%s1255_s26 + $0x538] sm:$0xff] }
  0x86   : > { %v454_v22 = vadd.f32 %v453_v14, %v301_v7  ;;  %v523_v24 = vadd.f32 %v522_v16, %v302_v11  ;;  %v333_v7 = vld [vmem:[%s1255_s26 + $0x540] sm:$0xff]  ;;  %v334_v11 = vld [vmem:[%s1255_s26 + $0x548] sm:$0xff] }
  0x87   : > { %v592_v25 = vadd.f32 %v591_v17, %v303_v12  ;;  %v661_v26 = vadd.f32 %v660_v18, %v304_v13  ;;  %v335_v12 = vld [vmem:[%s1255_s26 + $0x550] sm:$0xff]  ;;  %v336_v13 = vld [vmem:[%s1255_s26 + $0x558] sm:$0xff] }
  0x88   : > { %v455_v30 = vadd.f32 %v454_v22, %v305_v15  ;;  %v524_v32 = vadd.f32 %v523_v24, %v306_v19  ;;  %v337_v15 = vld [vmem:[%s1255_s26 + $0x560] sm:$0xff]  ;;  %v338_v19 = vld [vmem:[%s1255_s26 + $0x568] sm:$0xff] }
  0x89   : > { %v593_v33 = vadd.f32 %v592_v25, %v307_v20  ;;  %v662_v34 = vadd.f32 %v661_v26, %v308_v21  ;;  %v339_v20 = vld [vmem:[%s1255_s26 + $0x570] sm:$0xff]  ;;  %v340_v21 = vld [vmem:[%s1255_s26 + $0x578] sm:$0xff] }
  0x8a   : > { %v456_v38 = vadd.f32 %v455_v30, %v309_v23  ;;  %v525_v40 = vadd.f32 %v524_v32, %v310_v27  ;;  %v341_v23 = vld [vmem:[%s1255_s26 + $0x580] sm:$0xff]  ;;  %v342_v27 = vld [vmem:[%s1255_s26 + $0x588] sm:$0xff] }
  0x8b   : > { %v594_v41 = vadd.f32 %v593_v33, %v311_v28  ;;  %v663_v42 = vadd.f32 %v662_v34, %v312_v29  ;;  %v343_v28 = vld [vmem:[%s1255_s26 + $0x590] sm:$0xff]  ;;  %v344_v29 = vld [vmem:[%s1255_s26 + $0x598] sm:$0xff] }
  0x8c   : > { %v457_v46 = vadd.f32 %v456_v38, %v313_v31  ;;  %v526_v48 = vadd.f32 %v525_v40, %v314_v35  ;;  %v345_v31 = vld [vmem:[%s1255_s26 + $0x5a0] sm:$0xff]  ;;  %v346_v35 = vld [vmem:[%s1255_s26 + $0x5a8] sm:$0xff] }
  0x8d   : > { %v595_v49 = vadd.f32 %v594_v41, %v315_v36  ;;  %v664_v50 = vadd.f32 %v663_v42, %v316_v37  ;;  %v347_v36 = vld [vmem:[%s1255_s26 + $0x5b0] sm:$0xff]  ;;  %v348_v37 = vld [vmem:[%s1255_s26 + $0x5b8] sm:$0xff] }
  0x8e   : > { %v458_v54 = vadd.f32 %v457_v46, %v317_v39  ;;  %v527_v56 = vadd.f32 %v526_v48, %v318_v43  ;;  %v349_v39 = vld [vmem:[%s1255_s26 + $0x5c0] sm:$0xff]  ;;  %v350_v43 = vld [vmem:[%s1255_s26 + $0x5c8] sm:$0xff] }
  0x8f   : > { %v596_v57 = vadd.f32 %v595_v49, %v319_v44  ;;  %v665_v58 = vadd.f32 %v664_v50, %v320_v45  ;;  %v351_v44 = vld [vmem:[%s1255_s26 + $0x5d0] sm:$0xff]  ;;  %v352_v45 = vld [vmem:[%s1255_s26 + $0x5d8] sm:$0xff] }
  0x90   : > { %v459_v62 = vadd.f32 %v458_v54, %v321_v47  ;;  %v528_v0 = vadd.f32 %v527_v56, %v322_v51  ;;  %v353_v47 = vld [vmem:[%s1255_s26 + $0x5e0] sm:$0xff]  ;;  %v354_v51 = vld [vmem:[%s1255_s26 + $0x5e8] sm:$0xff] }
  0x91   : > { %v597_v1 = vadd.f32 %v596_v57, %v323_v52  ;;  %v666_v2 = vadd.f32 %v665_v58, %v324_v53  ;;  %v355_v52 = vld [vmem:[%s1255_s26 + $0x5f0] sm:$0xff]  ;;  %v356_v53 = vld [vmem:[%s1255_s26 + $0x5f8] sm:$0xff] }
  0x92   : > { %v460_v6 = vadd.f32 %v459_v62, %v325_v55  ;;  %v529_v8 = vadd.f32 %v528_v0, %v326_v59  ;;  %v357_v55 = vld [vmem:[%s1255_s26 + $0x600] sm:$0xff]  ;;  %v358_v59 = vld [vmem:[%s1255_s26 + $0x608] sm:$0xff] }
  0x93   : > { %v598_v9 = vadd.f32 %v597_v1, %v327_v60  ;;  %v667_v10 = vadd.f32 %v666_v2, %v328_v61  ;;  %v359_v60 = vld [vmem:[%s1255_s26 + $0x610] sm:$0xff]  ;;  %v360_v61 = vld [vmem:[%s1255_s26 + $0x618] sm:$0xff] }
  0x94   : > { %v461_v14 = vadd.f32 %v460_v6, %v329_v63  ;;  %v530_v16 = vadd.f32 %v529_v8, %v330_v3  ;;  %v361_v63 = vld [vmem:[%s1255_s26 + $0x620] sm:$0xff]  ;;  %v362_v3 = vld [vmem:[%s1255_s26 + $0x628] sm:$0xff] }
  0x95   : > { %v599_v17 = vadd.f32 %v598_v9, %v331_v4  ;;  %v668_v18 = vadd.f32 %v667_v10, %v332_v5  ;;  %v363_v4 = vld [vmem:[%s1255_s26 + $0x630] sm:$0xff]  ;;  %v364_v5 = vld [vmem:[%s1255_s26 + $0x638] sm:$0xff] }
  0x96   : > { %v462_v22 = vadd.f32 %v461_v14, %v333_v7  ;;  %v531_v24 = vadd.f32 %v530_v16, %v334_v11  ;;  %v365_v7 = vld [vmem:[%s1255_s26 + $0x640] sm:$0xff]  ;;  %v366_v11 = vld [vmem:[%s1255_s26 + $0x648] sm:$0xff] }
  0x97   : > { %v600_v25 = vadd.f32 %v599_v17, %v335_v12  ;;  %v669_v26 = vadd.f32 %v668_v18, %v336_v13  ;;  %v367_v12 = vld [vmem:[%s1255_s26 + $0x650] sm:$0xff]  ;;  %v368_v13 = vld [vmem:[%s1255_s26 + $0x658] sm:$0xff] }
  0x98   : > { %v463_v30 = vadd.f32 %v462_v22, %v337_v15  ;;  %v532_v32 = vadd.f32 %v531_v24, %v338_v19  ;;  %v369_v15 = vld [vmem:[%s1255_s26 + $0x660] sm:$0xff]  ;;  %v370_v19 = vld [vmem:[%s1255_s26 + $0x668] sm:$0xff] }
  0x99   : > { %v601_v33 = vadd.f32 %v600_v25, %v339_v20  ;;  %v670_v34 = vadd.f32 %v669_v26, %v340_v21  ;;  %v371_v20 = vld [vmem:[%s1255_s26 + $0x670] sm:$0xff]  ;;  %v372_v21 = vld [vmem:[%s1255_s26 + $0x678] sm:$0xff] }
  0x9a   : > { %v464_v38 = vadd.f32 %v463_v30, %v341_v23  ;;  %v533_v40 = vadd.f32 %v532_v32, %v342_v27  ;;  %v373_v23 = vld [vmem:[%s1255_s26 + $0x680] sm:$0xff]  ;;  %v374_v27 = vld [vmem:[%s1255_s26 + $0x688] sm:$0xff] }
  0x9b   : > { %v602_v41 = vadd.f32 %v601_v33, %v343_v28  ;;  %v671_v42 = vadd.f32 %v670_v34, %v344_v29  ;;  %v375_v28 = vld [vmem:[%s1255_s26 + $0x690] sm:$0xff]  ;;  %v376_v29 = vld [vmem:[%s1255_s26 + $0x698] sm:$0xff] }
  0x9c   : > { %v465_v46 = vadd.f32 %v464_v38, %v345_v31  ;;  %v534_v48 = vadd.f32 %v533_v40, %v346_v35  ;;  %v377_v31 = vld [vmem:[%s1255_s26 + $0x6a0] sm:$0xff]  ;;  %v378_v35 = vld [vmem:[%s1255_s26 + $0x6a8] sm:$0xff] }
  0x9d   : > { %v603_v49 = vadd.f32 %v602_v41, %v347_v36  ;;  %v672_v50 = vadd.f32 %v671_v42, %v348_v37  ;;  %v379_v36 = vld [vmem:[%s1255_s26 + $0x6b0] sm:$0xff]  ;;  %v380_v37 = vld [vmem:[%s1255_s26 + $0x6b8] sm:$0xff] }
  0x9e   : > { %v466_v54 = vadd.f32 %v465_v46, %v349_v39  ;;  %v535_v56 = vadd.f32 %v534_v48, %v350_v43  ;;  %v381_v39 = vld [vmem:[%s1255_s26 + $0x6c0] sm:$0xff]  ;;  %v382_v43 = vld [vmem:[%s1255_s26 + $0x6c8] sm:$0xff] }
  0x9f   : > { %v604_v57 = vadd.f32 %v603_v49, %v351_v44  ;;  %v673_v58 = vadd.f32 %v672_v50, %v352_v45  ;;  %v383_v44 = vld [vmem:[%s1255_s26 + $0x6d0] sm:$0xff]  ;;  %v384_v45 = vld [vmem:[%s1255_s26 + $0x6d8] sm:$0xff] }
  0xa0   : > { %v467_v62 = vadd.f32 %v466_v54, %v353_v47  ;;  %v536_v0 = vadd.f32 %v535_v56, %v354_v51  ;;  %v385_v47 = vld [vmem:[%s1255_s26 + $0x6e0] sm:$0xff]  ;;  %v386_v51 = vld [vmem:[%s1255_s26 + $0x6e8] sm:$0xff] }
  0xa1   : > { %v605_v1 = vadd.f32 %v604_v57, %v355_v52  ;;  %v674_v2 = vadd.f32 %v673_v58, %v356_v53  ;;  %v387_v52 = vld [vmem:[%s1255_s26 + $0x6f0] sm:$0xff]  ;;  %v388_v53 = vld [vmem:[%s1255_s26 + $0x6f8] sm:$0xff] }
  0xa2   : > { %v468_v6 = vadd.f32 %v467_v62, %v357_v55  ;;  %v537_v8 = vadd.f32 %v536_v0, %v358_v59  ;;  %v389_v55 = vld [vmem:[%s1255_s26 + $0x700] sm:$0xff]  ;;  %v390_v59 = vld [vmem:[%s1255_s26 + $0x708] sm:$0xff] }
  0xa3   : > { %v606_v9 = vadd.f32 %v605_v1, %v359_v60  ;;  %v675_v10 = vadd.f32 %v674_v2, %v360_v61  ;;  %v391_v60 = vld [vmem:[%s1255_s26 + $0x710] sm:$0xff]  ;;  %v392_v61 = vld [vmem:[%s1255_s26 + $0x718] sm:$0xff] }
  0xa4   : > { %v469_v14 = vadd.f32 %v468_v6, %v361_v63  ;;  %v538_v16 = vadd.f32 %v537_v8, %v362_v3  ;;  %v393_v63 = vld [vmem:[%s1255_s26 + $0x720] sm:$0xff]  ;;  %v394_v3 = vld [vmem:[%s1255_s26 + $0x728] sm:$0xff] }
  0xa5   : > { %v607_v17 = vadd.f32 %v606_v9, %v363_v4  ;;  %v676_v18 = vadd.f32 %v675_v10, %v364_v5  ;;  %v395_v4 = vld [vmem:[%s1255_s26 + $0x730] sm:$0xff]  ;;  %v396_v5 = vld [vmem:[%s1255_s26 + $0x738] sm:$0xff] }
  0xa6   : > { %v470_v22 = vadd.f32 %v469_v14, %v365_v7  ;;  %v539_v24 = vadd.f32 %v538_v16, %v366_v11  ;;  %v397_v7 = vld [vmem:[%s1255_s26 + $0x740] sm:$0xff]  ;;  %v398_v11 = vld [vmem:[%s1255_s26 + $0x748] sm:$0xff] }
  0xa7   : > { %v608_v25 = vadd.f32 %v607_v17, %v367_v12  ;;  %v677_v26 = vadd.f32 %v676_v18, %v368_v13  ;;  %v399_v12 = vld [vmem:[%s1255_s26 + $0x750] sm:$0xff]  ;;  %v400_v13 = vld [vmem:[%s1255_s26 + $0x758] sm:$0xff] }
  0xa8   : > { %v471_v30 = vadd.f32 %v470_v22, %v369_v15  ;;  %v540_v32 = vadd.f32 %v539_v24, %v370_v19  ;;  %v401_v15 = vld [vmem:[%s1255_s26 + $0x760] sm:$0xff]  ;;  %v402_v19 = vld [vmem:[%s1255_s26 + $0x768] sm:$0xff] }
  0xa9   : > { %v609_v33 = vadd.f32 %v608_v25, %v371_v20  ;;  %v678_v34 = vadd.f32 %v677_v26, %v372_v21  ;;  %v403_v20 = vld [vmem:[%s1255_s26 + $0x770] sm:$0xff]  ;;  %v404_v21 = vld [vmem:[%s1255_s26 + $0x778] sm:$0xff] }
  0xaa   : > { %v472_v38 = vadd.f32 %v471_v30, %v373_v23  ;;  %v541_v40 = vadd.f32 %v540_v32, %v374_v27  ;;  %v405_v23 = vld [vmem:[%s1255_s26 + $0x780] sm:$0xff]  ;;  %v406_v27 = vld [vmem:[%s1255_s26 + $0x788] sm:$0xff] }
  0xab   : > { %v610_v41 = vadd.f32 %v609_v33, %v375_v28  ;;  %v679_v42 = vadd.f32 %v678_v34, %v376_v29  ;;  %v407_v28 = vld [vmem:[%s1255_s26 + $0x790] sm:$0xff]  ;;  %v408_v29 = vld [vmem:[%s1255_s26 + $0x798] sm:$0xff] }
  0xac   : > { %v473_v46 = vadd.f32 %v472_v38, %v377_v31  ;;  %v542_v48 = vadd.f32 %v541_v40, %v378_v35  ;;  %v409_v31 = vld [vmem:[%s1255_s26 + $0x7a0] sm:$0xff]  ;;  %v410_v35 = vld [vmem:[%s1255_s26 + $0x7a8] sm:$0xff] }
  0xad   : > { %v611_v49 = vadd.f32 %v610_v41, %v379_v36  ;;  %v680_v50 = vadd.f32 %v679_v42, %v380_v37  ;;  %v411_v36 = vld [vmem:[%s1255_s26 + $0x7b0] sm:$0xff]  ;;  %v412_v37 = vld [vmem:[%s1255_s26 + $0x7b8] sm:$0xff] }
  0xae   : > { %v474_v54 = vadd.f32 %v473_v46, %v381_v39  ;;  %v543_v56 = vadd.f32 %v542_v48, %v382_v43  ;;  %v413_v39 = vld [vmem:[%s1255_s26 + $0x7c0] sm:$0xff]  ;;  %v414_v43 = vld [vmem:[%s1255_s26 + $0x7c8] sm:$0xff] }
  0xaf   : > { %v612_v57 = vadd.f32 %v611_v49, %v383_v44  ;;  %v681_v58 = vadd.f32 %v680_v50, %v384_v45  ;;  %v415_v44 = vld [vmem:[%s1255_s26 + $0x7d0] sm:$0xff]  ;;  %v416_v45 = vld [vmem:[%s1255_s26 + $0x7d8] sm:$0xff] }
  0xb0   : > { %v475_v62 = vadd.f32 %v474_v54, %v385_v47  ;;  %v544_v0 = vadd.f32 %v543_v56, %v386_v51  ;;  %v417_v47 = vld [vmem:[%s1255_s26 + $0x7e0] sm:$0xff]  ;;  %v418_v51 = vld [vmem:[%s1255_s26 + $0x7e8] sm:$0xff] }
  0xb1   : > { %v613_v1 = vadd.f32 %v612_v57, %v387_v52  ;;  %v682_v2 = vadd.f32 %v681_v58, %v388_v53  ;;  %v419_v52 = vld [vmem:[%s1255_s26 + $0x7f0] sm:$0xff]  ;;  %v420_v53 = vld [vmem:[%s1255_s26 + $0x7f8] sm:$0xff] }
  0xb2   : > { %v476_v6 = vadd.f32 %v475_v62, %v389_v55  ;;  %v545_v8 = vadd.f32 %v544_v0, %v390_v59 }
  0xb3   : > { %v614_v9 = vadd.f32 %v613_v1, %v391_v60  ;;  %v683_v10 = vadd.f32 %v682_v2, %v392_v61 }
  0xb4   : > { %v477_v14 = vadd.f32 %v476_v6, %v393_v63  ;;  %v546_v16 = vadd.f32 %v545_v8, %v394_v3  ;;  %v1123_v3 = vmov 1966171168   ;;  %v706_v8 = vlaneseq }
  0xb5   : > { %v615_v17 = vadd.f32 %v614_v9, %v395_v4  ;;  %v684_v18 = vadd.f32 %v683_v10, %v396_v5  ;;  %v704_v4 = vunpack.c.l.s4 %v1123_v3 }
  0xb6   : > { %v478_v22 = vadd.f32 %v477_v14, %v397_v7  ;;  %v547_v24 = vadd.f32 %v546_v16, %v398_v11  ;;  %vm729_vm1 = vcmp.lt.s32.totalorder %v706_v8, 512 }
  0xb7   : > { %v616_v25 = vadd.f32 %v615_v17, %v399_v12  ;;  %v685_v26 = vadd.f32 %v684_v18, %v400_v13  ;;  %v705_v14 = vunpack.c.0.s8 %v704_v4  ;;  %v707_v18 = vshrl.u32 %v706_v8, 7 }
  0xb8   : > { %v479_v30 = vadd.f32 %v478_v22, %v401_v15  ;;  %v548_v32 = vadd.f32 %v547_v24, %v402_v19 }
  0xb9   : > { %v617_v33 = vadd.f32 %v616_v25, %v403_v20  ;;  %v686_v34 = vadd.f32 %v685_v26, %v404_v21 }
  0xba   : > { %v480_v38 = vadd.f32 %v479_v30, %v405_v23  ;;  %v549_v40 = vadd.f32 %v548_v32, %v406_v27  ;;  %v708_v27 = vsub.s32 %v705_v14, %v707_v18 }
  0xbb   : > { %v618_v41 = vadd.f32 %v617_v33, %v407_v28  ;;  %v687_v42 = vadd.f32 %v686_v34, %v408_v29  ;;  %v164_v33 = vld [vmem:[%s1264_s20] sm:$0xf] }
  0xbc   : > { %v481_v46 = vadd.f32 %v480_v38, %v409_v31  ;;  %v550_v48 = vadd.f32 %v549_v40, %v410_v35 }
  0xbd   : > { %v619_v49 = vadd.f32 %v618_v41, %v411_v36  ;;  %v688_v50 = vadd.f32 %v687_v42, %v412_v37 }
  0xbe   : > { %v482_v54 = vadd.f32 %v481_v46, %v413_v39  ;;  %v551_v55 = vadd.f32 %v550_v48, %v414_v43 }
  0xbf   : > { %v620_v56 = vadd.f32 %v619_v49, %v415_v44  ;;  %v689_v57 = vadd.f32 %v688_v50, %v416_v45 }
  0xc0   : > { %v483_v58 = vadd.f32 %v482_v54, %v417_v47  ;;  %v552_v59 = vadd.f32 %v551_v55, %v418_v51 }
  0xc1   : > { %v621_v60 = vadd.f32 %v620_v56, %v419_v52  ;;  %v690_v61 = vadd.f32 %v689_v57, %v420_v53 }
  0xc2   : > { %v484_v62 = vrot.slane %v483_v58, 4  ;;  %v553_v63 = vrot.slane %v552_v59, 4 }
  0xc3   : > { %v622_v0 = vrot.slane %v621_v60, 4  ;;  %v691_v1 = vrot.slane %v690_v61, 4 }
  0xc4   : > { %v485_v2 = vadd.f32 %v484_v62, %v483_v58  ;;  %v554_v5 = vadd.f32 %v553_v63, %v552_v59 }
  0xc5   : > { %v623_v6 = vadd.f32 %v622_v0, %v621_v60  ;;  %v692_v7 = vadd.f32 %v691_v1, %v690_v61 }
  0xc6   : > { %v486_v9 = vrot.slane %v485_v2, 2  ;;  %v555_v10 = vrot.slane %v554_v5, 2 }
  0xc7   : > { %v624_v11 = vrot.slane %v623_v6, 2  ;;  %v693_v12 = vrot.slane %v692_v7, 2 }
  0xc8   : > { %v487_v13 = vadd.f32 %v486_v9, %v485_v2  ;;  %v556_v15 = vadd.f32 %v555_v10, %v554_v5 }
  0xc9   : > { %v625_v16 = vadd.f32 %v624_v11, %v623_v6  ;;  %v694_v17 = vadd.f32 %v693_v12, %v692_v7 }
  0xca   : > { %v488_v19 = vrot.slane %v487_v13, 1  ;;  %v557_v20 = vrot.slane %v556_v15, 1 }
  0xcb   : > { %v626_v21 = vrot.slane %v625_v16, 1  ;;  %v695_v22 = vrot.slane %v694_v17, 1 }
  0xcc   : > { %v489_v23 = vadd.f32 %v488_v19, %v487_v13  ;;  %v558_v24 = vadd.f32 %v557_v20, %v556_v15 }
  0xcd   : > { %v627_v25 = vadd.f32 %v626_v21, %v625_v16  ;;  %v696_v26 = vadd.f32 %v695_v22, %v694_v17 }
  0xce   : > { %v701_v28 = vcombine.low %v489_v23, %v558_v24 }
  0xcf   : > { %v702_v29 = vcombine.low %v627_v25, %v696_v26 }
  0xd0   : > { %v709_v30 = vrot.slane %v701_v28, %v708_v27 }
  0xd1   : > { %v716_v31 = vrot.slane %v702_v29, %v708_v27 }
  0xd3   : > { %v717_v32 = vcombine.low %v709_v30, %v716_v31 }
  0xd5   : > { %v724_v34 = vrot.slane %v717_v32, %v708_v27  ;;  %735 = sbr.rel (%p851_p7) target bundleno = 240 (0xf0), region = 36 }
  0xd7   : > { %v726_v35 = vadd.f32 %v724_v34, %v164_v33 }
  0xd9   : > { %731 = vst.msk [vmem:[%s1264_s20] sm:$0xf] %vm729_vm1, %v726_v35 }
  0xe0   : > { %v736_v36 = vld [vmem:[%s1264_s20] sm:$0xf] }
  0xe1   : > { %966 = vrsqrt.f32 %v736_v36 }
  0xee   : > { %v967_v37 = vpop.eup %966 }
  0xef   : > { %738 = vst.msk [vmem:[%s1264_s20] sm:$0xf] %vm729_vm1, %v967_v37 }
  0xf0 PF: > { %s857_s25 = sshll.u32 %s1104_s13, 6  ;;  %s754_s4 = sshll.u32 %s1264_s20, 4  ;;  %s755_s4 = int_to_ptr.vmem [resolvable:$true] %s754_s4 }
  0xf1   : > { %s752_s23 = scalar_lea.hbm %s1586_s1, %s857_s25  ;;  %s740_s12 = scalar_lea.sflag [#allocation4], %s149_s24 }
  0xf2   : > { %s996_s17 = scalar_lea.vmem %s755_s4, 64  ;;  %s1124_s5 = smov [#allocation5]  }
  0xf3   : > { %p997_p5 = scmp.ne.s32.totalorder %s755_s4, %s996_s17  ;;  %s1000_s3 = sshll.u32 %s1124_s5, 4  ;;  %s1001_s3 = int_to_ptr.vmem [resolvable:$false] %s1000_s3 }
  0xf4   : > { %s1002_s9 = scalar_lea.vmem %s1001_s3, 128  ;;  %p1003_p10 = scmp.lt.s32.totalorder %s755_s4, %s1001_s3 }
  0xf5   : > { %p998_p8 = pnand %p997_p5, %p1217_p12  ;;  %p1004_p3 = scmp.lt.s32.totalorder %s1002_s9, %s996_s17 }
  0xf7   : > { %p999_p9 = pneg %p998_p8  ;;  %p1005_p11 = por %p1004_p3, %p1003_p10 }
  0xf9   : > { %p1006_p13 = pnand %p1005_p11, %p999_p9 }
  0xfb   : > { %1009 = shalt.err (!%p1006_p13)
}
  0xfc   : > { %s1010_s13 = scalar_lea.hbm %s752_s23, 64  ;;  %s1014_s15 = scalar_lea.hbm %s1586_s1, 192 }
  0xfd   : > { %p1011_p0 = scmp.ne.s32.totalorder %s752_s23, %s1010_s13  ;;  %p1015_p4 = scmp.lt.s32.totalorder %s752_s23, %s1586_s1 }
  0xfe   : > { %p1016_p7 = scmp.lt.s32.totalorder %s1014_s15, %s1010_s13 }
  0xff   : > { %p1012_p1 = pnand %p1011_p0, %p1217_p12 }
 0x100   : > { %p1017_p5 = por %p1016_p7, %p1015_p4 }
 0x101   : > { %p1013_p6 = pneg %p1012_p1 }
 0x103   : > { %p1018_p8 = pnand %p1017_p5, %p1013_p6 }
 0x105   : > { %1021 = shalt.err (!%p1018_p8)
}
 0x106   : > { %861 = dma.vmem_to_hbm [thread:$0]  (%p1217_p12), %s755_s4, 64, %s752_s23, %s740_s12  }
 0x107 PF: > { %p872_p9 = scmp.ge.s32.totalorder %s1116_s16, 2  ;;  %s766_s19 = sand.u32 1, %s1076_s6  }
 0x108   : > { %s767_s20 = scalar_lea.sflag [#allocation4], %s766_s19 }
 0x109   : > { %p868_p10 = pnand %p872_p9, %p1230_p2 }
 0x10b   : > { %p869_p3 = pneg %p868_p10 }
 0x10d   : > { %1071 = dma.done.wait (%p869_p3), %s767_s20, 64  }
 0x10e   : > { %1073 = vsyncadd (%p869_p3), %s767_s20, 4294967232  ;;  %s17_s16 = sadd.s32 1, %s1116_s16   ;;  %s1598_s13 = sld [smem:[#allocation8_spill]] }
 0x10f   : > { %p14_p11 = scmp.ge.s32.totalorder %s17_s16, 11   ;;  %s1599_s28 = sld [smem:[#allocation9_spill]] }
 0x110   : > { %s1600_s15 = sld [smem:[#allocation10_spill]]  ;;  %s1601_s6 = smov %s1080_s7 }
 0x111   : > { %s1602_s7 = smov %s1084_s8  ;;  %s1603_s8 = smov %s1222_s29 }
 0x112   : > { %s1604_s9 = smov %s1092_s10  ;;  %s1605_s10 = smov %s1096_s11 }
 0x113   : > { %s1606_s11 = smov %s1225_s30  ;;  %s1607_s12 = smov %s1108_s14 }
 0x114   :  { %16 = sbr.rel (!%p14_p11) target bundleno = 9 (0x9), region = 77 }
 0x115   : > { %s1608_s14 = smov %s1599_s28 }
 0x119   :  { %772 = vsyncpa [#allocation3], 1 }
 0x11a   :  { %774 = vsyncpa [#allocation3 + $0x1], 1 }
 0x11b   :  { %775 = vsyncpa [#allocation4], 1 }
 0x11c   :  { %777 = vsyncpa [#allocation4 + $0x1], 1 }

</bundles_post_ra>
